<compile_context>
chip_gen: v7x
topology: tpu7x:2x2x1
jax: 0.10.0
libtpu: 0.0.40
codegen_flags: <defaults>
</compile_context>

<pallas_src>
import functools
import math

import jax
import jax.numpy as jnp
from jax.experimental import pallas as pl
from jax.experimental.pallas import tpu as pltpu


_FUSED_VMEM_BYTES = 1 * 1024 * 1024   # f32-equivalent x size for the fused path
_FUSED_MAX_BATCH = 32                 # unroll bound for the fused kernel's N loop
_TILE_TARGET_BYTES = 1 * 1024 * 1024  # ~native bytes of x per block (tiled path)


def _round_up(x, m):
    return (x + m - 1) // m * m


# --------------------------------------------------------------------------
# Kernels
# --------------------------------------------------------------------------
def _bn_train_fused_kernel(x_ref, gb_ref, y_ref, mv_ref, *, eps):
    """Fully fused training BatchNorm for small inputs (x resident in VMEM).

    x_ref : (N, C, L) native dtype -- one HBM read, re-read from VMEM per pass
    gb_ref: (C, 2) f32, lane 0 = gamma, lane 1 = beta
    y_ref : (N, C, L) x.dtype
    mv_ref: (C, 2) f32, lane 0 = batch mean, lane 1 = biased batch var
    """
    n, c, l = x_ref.shape
    inv_count = 1.0 / float(n * l)

    # pass 1: per-channel mean (f32 accumulation, lane reduce + batch unroll)
    s_cl = x_ref[0].astype(jnp.float32)                      # (C, L)
    for i in range(1, n):
        s_cl = s_cl + x_ref[i].astype(jnp.float32)
    mean_c = jnp.sum(s_cl, axis=-1, keepdims=True) * inv_count   # (C, 1)

    # pass 2: mean-subtracted variance (no E[x^2]-E[x]^2 cancellation)
    d = x_ref[0].astype(jnp.float32) - mean_c
    sq_cl = d * d
    for i in range(1, n):
        d = x_ref[i].astype(jnp.float32) - mean_c
        sq_cl = sq_cl + d * d
    var_c = jnp.sum(sq_cl, axis=-1, keepdims=True) * inv_count   # (C, 1)

    gb = gb_ref[...]                                          # (C, 2) f32
    gamma_c = gb[:, 0:1]
    beta_c = gb[:, 1:2]
    scale_c = gamma_c * jax.lax.rsqrt(var_c + eps)            # (C, 1)

    # pass 3: normalize + affine, cast back to the output dtype
    for i in range(n):
        xi = x_ref[i].astype(jnp.float32)
        y_ref[i] = ((xi - mean_c) * scale_c + beta_c).astype(y_ref.dtype)

    mv_ref[:, 0:1] = mean_c
    mv_ref[:, 1:2] = var_c


def _bn_stats_kernel(x_ref, ss_ref):
    """Per-row [sum, sum-of-squares] over the lane axis (f32 accumulation).

    x_ref : (block_rows, L) native dtype; rows are flattened (n, c) pairs
    ss_ref: (block_rows, 2) f32, lane 0 = sum(x), lane 1 = sum(x*x)
    """
    x = x_ref[...].astype(jnp.float32)
    ss_ref[:, 0:1] = jnp.sum(x, axis=1, keepdims=True)
    ss_ref[:, 1:2] = jnp.sum(x * x, axis=1, keepdims=True)


def _bn_apply_kernel(x_ref, ss_ref, y_ref):
    """y = x * scale + shift, per-row scale/shift packed on the lane axis.

    x_ref : (block_rows, L) native dtype
    ss_ref: (block_rows, 2) f32, lane 0 = scale, lane 1 = shift
    y_ref : (block_rows, L) x.dtype
    """
    x = x_ref[...].astype(jnp.float32)
    scale = ss_ref[:, 0:1]
    shift = ss_ref[:, 1:2]
    y_ref[...] = (x * scale + shift).astype(y_ref.dtype)


# --------------------------------------------------------------------------
# pallas_call wrappers
# --------------------------------------------------------------------------
def _pick_block_rows(n_rows, row_bytes):
    """Largest multiple-of-8 row count whose x block stays near ~1 MiB."""
    rows = (_TILE_TARGET_BYTES // max(row_bytes, 1)) // 8 * 8
    rows = max(rows, 8)
    rows = min(rows, _round_up(n_rows, 8), 1024)
    return rows


def _train_fused(x3d, gamma, beta, eps):
    """Single-call training BN on a VMEM-resident (N, C, L) tensor."""
    N, C, L = x3d.shape
    gb = jnp.stack([gamma, beta], axis=1).astype(jnp.float32)   # (C, 2)
    in_b = x3d.dtype.itemsize
    kern = functools.partial(_bn_train_fused_kernel, eps=float(eps))
    y, mv = pl.pallas_call(
        kern,
        out_shape=(jax.ShapeDtypeStruct((N, C, L), x3d.dtype),
                   jax.ShapeDtypeStruct((C, 2), jnp.float32)),
        grid_spec=pltpu.PrefetchScalarGridSpec(
            num_scalar_prefetch=0,
            grid=(1,),
            in_specs=[pl.BlockSpec((N, C, L), lambda i: (0, 0, 0)),
                      pl.BlockSpec((C, 2), lambda i: (0, 0))],
            out_specs=(pl.BlockSpec((N, C, L), lambda i: (0, 0, 0)),
                       pl.BlockSpec((C, 2), lambda i: (0, 0))),
        ),
        compiler_params=pltpu.CompilerParams(
            dimension_semantics=("arbitrary",)),
        cost_estimate=pl.CostEstimate(
            flops=7 * N * C * L,
            transcendentals=C,
            bytes_accessed=2 * N * C * L * in_b + 4 * C * 4),
    )(x3d, gb)
    return y, mv[:, 0], mv[:, 1]


def _row_stats(x2d, block_rows):
    """x2d: (R, L) -> packed per-row (sum, sumsq) as an (R, 2) f32 array."""
    R, L = x2d.shape
    dbytes = x2d.dtype.itemsize
    return pl.pallas_call(
        _bn_stats_kernel,
        out_shape=jax.ShapeDtypeStruct((R, 2), jnp.float32),
        grid_spec=pltpu.PrefetchScalarGridSpec(
            num_scalar_prefetch=0,
            grid=(pl.cdiv(R, block_rows),),
            in_specs=[pl.BlockSpec((block_rows, L), lambda i: (i, 0))],
            out_specs=pl.BlockSpec((block_rows, 2), lambda i: (i, 0)),
        ),
        compiler_params=pltpu.CompilerParams(
            dimension_semantics=("parallel",)),
        cost_estimate=pl.CostEstimate(
            flops=3 * R * L, transcendentals=0,
            bytes_accessed=R * L * dbytes + R * 2 * 4),
    )(x2d)


def _row_apply(x2d, ss_rows, block_rows, out_dtype):
    """Fused per-row affine: (R, L) * scale + shift with (R, 2) packed params."""
    R, L = x2d.shape
    in_b = x2d.dtype.itemsize
    out_b = jnp.dtype(out_dtype).itemsize
    return pl.pallas_call(
        _bn_apply_kernel,
        out_shape=jax.ShapeDtypeStruct((R, L), out_dtype),
        grid_spec=pltpu.PrefetchScalarGridSpec(
            num_scalar_prefetch=0,
            grid=(pl.cdiv(R, block_rows),),
            in_specs=[pl.BlockSpec((block_rows, L), lambda i: (i, 0)),
                      pl.BlockSpec((block_rows, 2), lambda i: (i, 0))],
            out_specs=pl.BlockSpec((block_rows, L), lambda i: (i, 0)),
        ),
        compiler_params=pltpu.CompilerParams(
            dimension_semantics=("parallel",)),
        cost_estimate=pl.CostEstimate(
            flops=2 * R * L, transcendentals=0,
            bytes_accessed=R * L * (in_b + out_b) + R * 2 * 4),
    )(x2d, ss_rows)


# --------------------------------------------------------------------------
# _BatchNorm forward
# --------------------------------------------------------------------------
def batch_norm_forward(x, weight, bias, running_mean, running_var,
                       training=True, momentum=0.1, eps=1e-5,
                       num_batches_tracked=0,
                       fused_bytes_limit=_FUSED_VMEM_BYTES):
    """Forward of _BatchNorm on (N, C, ...) input.

    Returns (y, new_running_mean, new_running_var, new_num_batches_tracked).
    The PyTorch module mutates its buffers in place; updates are returned
    functionally here.
    """
    assert x.ndim >= 2, "expected (N, C, ...) input"
    N, C = x.shape[0], x.shape[1]
    L = int(math.prod(x.shape[2:]))
    in_shape = x.shape
    out_dtype = x.dtype

    track_running_stats = (running_mean is not None) and (running_var is not None)
    use_batch_stats = training or not track_running_stats

    # num_batches_tracked / exponential_average_factor bookkeeping (incl.
    # momentum=None -> cumulative moving average), as in the module's forward().
    eaf = 0.0 if momentum is None else momentum
    new_nbt = num_batches_tracked
    if training and track_running_stats:
        new_nbt = num_batches_tracked + 1
        eaf = (1.0 / float(new_nbt)) if momentum is None else momentum

    gamma = (weight if weight is not None
             else jnp.ones((C,), jnp.float32)).astype(jnp.float32)
    beta = (bias if bias is not None
            else jnp.zeros((C,), jnp.float32)).astype(jnp.float32)

    count = N * L
    x_bytes_f32 = N * C * L * 4

    if (use_batch_stats and x_bytes_f32 <= fused_bytes_limit
            and N <= _FUSED_MAX_BATCH):
        # Single fused pallas_call: x is read from HBM exactly once.
        x3d = x.reshape(N, C, L)          # contiguous-minor collapse: no copy
        y3d, mean, var = _train_fused(x3d, gamma, beta, eps)
        y = y3d.reshape(in_shape)
    else:
        # Tiled fallback: lane-dense (N*C, H*W) slab, no pads / slices.
        R = N * C
        x2d = x.reshape(R, L)
        block_rows = _pick_block_rows(R, L * x.dtype.itemsize)

        if use_batch_stats:
            # TODO(synk): E[x^2]-E[x]^2 in f32 can cancel for badly-centred
            # data on this large-tensor fallback; the fused path is two-pass.
            ss = _row_stats(x2d, block_rows)            # (R, 2) [sum, sumsq]
            ch = ss.reshape(N, C, 2).sum(axis=0)        # (C, 2) tiny combine
            mean = ch[:, 0] / count
            var = jnp.maximum(ch[:, 1] / count - mean * mean, 0.0)
        else:
            mean = running_mean.astype(jnp.float32)
            var = running_var.astype(jnp.float32)

        # Fold everything into one per-channel scale/shift (C-sized math),
        # expand to per-(n, c) rows, packed as one (R, 2) array.
        scale_c = gamma * jax.lax.rsqrt(var + eps)
        shift_c = beta - mean * scale_c
        ss_rows = jnp.broadcast_to(
            jnp.stack([scale_c, shift_c], axis=1)[None, :, :],
            (N, C, 2)).reshape(R, 2).astype(jnp.float32)

        y2d = _row_apply(x2d, ss_rows, block_rows, out_dtype)
        y = y2d.reshape(in_shape)

    # Running-stat EMA (unbiased variance), returned functionally.
    if training and track_running_stats:
        if count > 1:
            var_unbiased = var * (count / (count - 1.0))
        else:
            # PyTorch would divide by zero here; keep the biased value instead.
            var_unbiased = var
        new_rm = (1.0 - eaf) * running_mean + eaf * mean
        new_rv = (1.0 - eaf) * running_var + eaf * var_unbiased
    else:
        new_rm, new_rv = running_mean, running_var

    return y, new_rm, new_rv, new_nbt


# --------------------------------------------------------------------------
# Pure-JAX reference for validation
# --------------------------------------------------------------------------
def _ref_batch_norm(x, weight, bias, rm, rv, training, eps=1e-5):
    if training:
        mean = jnp.mean(x, axis=(0, 2, 3))
        var = jnp.var(x, axis=(0, 2, 3))
    else:
        mean, var = rm, rv
    inv = 1.0 / jnp.sqrt(var + eps)
    y = (x - mean[None, :, None, None]) * inv[None, :, None, None]
    return y * weight[None, :, None, None] + bias[None, :, None, None]


if __name__ == "__main__":
    N, C, H, W = 2, 4, 16, 16
    key = jax.random.PRNGKey(0)
    kx, kw, kb = jax.random.split(key, 3)

    x = jax.random.normal(kx, (N, C, H, W), jnp.float32)
    weight = 1.0 + 0.1 * jax.random.normal(kw, (C,), jnp.float32)
    bias = 0.1 * jax.random.normal(kb, (C,), jnp.float32)
    running_mean = jnp.zeros((C,), jnp.float32)
    running_var = jnp.ones((C,), jnp.float32)

    # training mode: fused single-kernel path
    y_tr, rm_tr, rv_tr, nbt = batch_norm_forward(
        x, weight, bias, running_mean, running_var,
        training=True, momentum=0.1, eps=1e-5, num_batches_tracked=0)
    y_tr = jax.block_until_ready(y_tr)

    # training mode: force the tiled fallback (stats kernel + apply kernel)
    y_tr2, rm_tr2, rv_tr2, _ = batch_norm_forward(
        x, weight, bias, running_mean, running_var,
        training=True, momentum=0.1, eps=1e-5, num_batches_tracked=0,
        fused_bytes_limit=0)
    y_tr2 = jax.block_until_ready(y_tr2)

    # eval mode: running statistics, tiled apply path
    y_ev, _, _, _ = batch_norm_forward(
        x, weight, bias, running_mean, running_var,
        training=False, momentum=0.1, eps=1e-5, num_batches_tracked=1)
    y_ev = jax.block_until_ready(y_ev)

    # references
    ref_tr = _ref_batch_norm(x, weight, bias, running_mean, running_var, True)
    ref_ev = _ref_batch_norm(x, weight, bias, running_mean, running_var, False)
    cnt = N * H * W
    ref_mean = jnp.mean(x, axis=(0, 2, 3))
    ref_var = jnp.var(x, axis=(0, 2, 3))
    ref_rm = 0.9 * running_mean + 0.1 * ref_mean
    ref_rv = 0.9 * running_var + 0.1 * ref_var * (cnt / (cnt - 1.0))

    assert y_tr.shape == (N, C, H, W) and y_tr.dtype == x.dtype
    assert bool(jnp.all(jnp.isfinite(y_tr))) and bool(jnp.all(jnp.isfinite(y_ev)))
    assert bool(jnp.allclose(y_tr, ref_tr, atol=1e-4, rtol=1e-4)), "fused training mismatch"
    assert bool(jnp.allclose(y_tr2, ref_tr, atol=1e-4, rtol=1e-4)), "tiled training mismatch"
    assert bool(jnp.allclose(y_ev, ref_ev, atol=1e-5, rtol=1e-5)), "eval-mode mismatch"
    assert bool(jnp.allclose(rm_tr, ref_rm, atol=1e-5, rtol=1e-5)), "running-mean mismatch"
    assert bool(jnp.allclose(rv_tr, ref_rv, atol=1e-5, rtol=1e-5)), "running-var mismatch"
    assert bool(jnp.allclose(rm_tr2, ref_rm, atol=1e-5, rtol=1e-5))
    assert bool(jnp.allclose(rv_tr2, ref_rv, atol=1e-4, rtol=1e-4))
    assert nbt == 1

    print("KERNEL_OK")
</pallas_src>

<mosaic_0001>
module attributes {stable_mosaic.version = 11 : i64} {
  func.func @_bn_train_fused_kernel(%arg0: i32, %arg1: memref<2x4x256xf32, #tpu.memory_space<vmem>>, %arg2: memref<4x2xf32, #tpu.memory_space<vmem>>, %arg3: memref<2x4x256xf32, #tpu.memory_space<vmem>>, %arg4: memref<4x2xf32, #tpu.memory_space<vmem>>) attributes {dimension_semantics = [#tpu.dimension_semantics<arbitrary>], iteration_bounds = array<i64: 1>, scalar_prefetch = 0 : i64, scratch_operands = 0 : i64, tpu.core_type = #tpu.core_type<tc>, window_params = [{pipeline_mode = #tpu.pipeline_mode<synchronous>, transform_indices = @transform_0, window_bounds = array<i64: 2, 4, 256>}, {pipeline_mode = #tpu.pipeline_mode<synchronous>, transform_indices = @transform_1, window_bounds = array<i64: 4, 2>}, {pipeline_mode = #tpu.pipeline_mode<synchronous>, transform_indices = @transform_2, window_bounds = array<i64: 2, 4, 256>}, {pipeline_mode = #tpu.pipeline_mode<synchronous>, transform_indices = @transform_3, window_bounds = array<i64: 4, 2>}]} {
    %c0 = arith.constant 0 : index
    %c0_0 = arith.constant 0 : index
    %c0_1 = arith.constant 0 : index
    %0 = vector.load %arg1[%c0, %c0_0, %c0_1] : memref<2x4x256xf32, #tpu.memory_space<vmem>>, vector<1x4x256xf32>
    %1 = vector.shape_cast %0 : vector<1x4x256xf32> to vector<4x256xf32>
    %c1 = arith.constant 1 : index
    %c0_2 = arith.constant 0 : index
    %c0_3 = arith.constant 0 : index
    %2 = vector.load %arg1[%c1, %c0_2, %c0_3] : memref<2x4x256xf32, #tpu.memory_space<vmem>>, vector<1x4x256xf32>
    %3 = vector.shape_cast %2 : vector<1x4x256xf32> to vector<4x256xf32>
    %4 = arith.addf %1, %3 : vector<4x256xf32>
    %cst = arith.constant dense<0.000000e+00> : vector<4xf32>
    %5 = vector.multi_reduction <add>, %4, %cst [1] : vector<4x256xf32> to vector<4xf32>
    %6 = vector.shape_cast %5 : vector<4xf32> to vector<4x1xf32>
    %cst_4 = arith.constant 0.001953125 : f32
    %7 = vector.broadcast %cst_4 : f32 to vector<4x1xf32>
    %8 = arith.mulf %6, %7 : vector<4x1xf32>
    %c0_5 = arith.constant 0 : index
    %c0_6 = arith.constant 0 : index
    %c0_7 = arith.constant 0 : index
    %9 = vector.load %arg1[%c0_5, %c0_6, %c0_7] : memref<2x4x256xf32, #tpu.memory_space<vmem>>, vector<1x4x256xf32>
    %10 = vector.shape_cast %9 : vector<1x4x256xf32> to vector<4x256xf32>
    %11 = vector.broadcast %8 : vector<4x1xf32> to vector<4x256xf32>
    %12 = arith.subf %10, %11 : vector<4x256xf32>
    %13 = arith.mulf %12, %12 : vector<4x256xf32>
    %c1_8 = arith.constant 1 : index
    %c0_9 = arith.constant 0 : index
    %c0_10 = arith.constant 0 : index
    %14 = vector.load %arg1[%c1_8, %c0_9, %c0_10] : memref<2x4x256xf32, #tpu.memory_space<vmem>>, vector<1x4x256xf32>
    %15 = vector.shape_cast %14 : vector<1x4x256xf32> to vector<4x256xf32>
    %16 = vector.broadcast %8 : vector<4x1xf32> to vector<4x256xf32>
    %17 = arith.subf %15, %16 : vector<4x256xf32>
    %18 = arith.mulf %17, %17 : vector<4x256xf32>
    %19 = arith.addf %13, %18 : vector<4x256xf32>
    %cst_11 = arith.constant dense<0.000000e+00> : vector<4xf32>
    %20 = vector.multi_reduction <add>, %19, %cst_11 [1] : vector<4x256xf32> to vector<4xf32>
    %21 = vector.shape_cast %20 : vector<4xf32> to vector<4x1xf32>
    %cst_12 = arith.constant 0.001953125 : f32
    %22 = vector.broadcast %cst_12 : f32 to vector<4x1xf32>
    %23 = arith.mulf %21, %22 : vector<4x1xf32>
    %c0_13 = arith.constant 0 : index
    %c0_14 = arith.constant 0 : index
    %24 = vector.load %arg2[%c0_13, %c0_14] : memref<4x2xf32, #tpu.memory_space<vmem>>, vector<4x2xf32>
    %25 = vector.extract_strided_slice %24 {offsets = [0, 0], sizes = [4, 1], strides = [1, 1]} : vector<4x2xf32> to vector<4x1xf32>
    %26 = vector.extract_strided_slice %24 {offsets = [0, 1], sizes = [4, 1], strides = [1, 1]} : vector<4x2xf32> to vector<4x1xf32>
    %cst_15 = arith.constant 9.99999974E-6 : f32
    %27 = vector.broadcast %cst_15 : f32 to vector<4x1xf32>
    %28 = arith.addf %23, %27 : vector<4x1xf32>
    %29 = math.rsqrt %28 : vector<4x1xf32>
    %30 = arith.mulf %25, %29 : vector<4x1xf32>
    %c0_16 = arith.constant 0 : index
    %c0_17 = arith.constant 0 : index
    %c0_18 = arith.constant 0 : index
    %31 = vector.load %arg1[%c0_16, %c0_17, %c0_18] : memref<2x4x256xf32, #tpu.memory_space<vmem>>, vector<1x4x256xf32>
    %32 = vector.shape_cast %31 : vector<1x4x256xf32> to vector<4x256xf32>
    %33 = vector.broadcast %8 : vector<4x1xf32> to vector<4x256xf32>
    %34 = arith.subf %32, %33 : vector<4x256xf32>
    %35 = vector.broadcast %30 : vector<4x1xf32> to vector<4x256xf32>
    %36 = arith.mulf %34, %35 : vector<4x256xf32>
    %37 = vector.broadcast %26 : vector<4x1xf32> to vector<4x256xf32>
    %38 = arith.addf %36, %37 : vector<4x256xf32>
    %c0_19 = arith.constant 0 : index
    %c0_20 = arith.constant 0 : index
    %c0_21 = arith.constant 0 : index
    %39 = vector.load %arg3[%c0_19, %c0_20, %c0_21] : memref<2x4x256xf32, #tpu.memory_space<vmem>>, vector<1x4x256xf32>
    %40 = vector.shape_cast %39 : vector<1x4x256xf32> to vector<4x256xf32>
    %41 = vector.shape_cast %38 : vector<4x256xf32> to vector<1x4x256xf32>
    tpu.vector_store %arg3[%c0_19, %c0_20, %c0_21], %41 {strides = array<i32>} : memref<2x4x256xf32, #tpu.memory_space<vmem>>, vector<1x4x256xf32>,
    %c1_22 = arith.constant 1 : index
    %c0_23 = arith.constant 0 : index
    %c0_24 = arith.constant 0 : index
    %42 = vector.load %arg1[%c1_22, %c0_23, %c0_24] : memref<2x4x256xf32, #tpu.memory_space<vmem>>, vector<1x4x256xf32>
    %43 = vector.shape_cast %42 : vector<1x4x256xf32> to vector<4x256xf32>
    %44 = vector.broadcast %8 : vector<4x1xf32> to vector<4x256xf32>
    %45 = arith.subf %43, %44 : vector<4x256xf32>
    %46 = vector.broadcast %30 : vector<4x1xf32> to vector<4x256xf32>
    %47 = arith.mulf %45, %46 : vector<4x256xf32>
    %48 = vector.broadcast %26 : vector<4x1xf32> to vector<4x256xf32>
    %49 = arith.addf %47, %48 : vector<4x256xf32>
    %c1_25 = arith.constant 1 : index
    %c0_26 = arith.constant 0 : index
    %c0_27 = arith.constant 0 : index
    %50 = vector.load %arg3[%c1_25, %c0_26, %c0_27] : memref<2x4x256xf32, #tpu.memory_space<vmem>>, vector<1x4x256xf32>
    %51 = vector.shape_cast %50 : vector<1x4x256xf32> to vector<4x256xf32>
    %52 = vector.shape_cast %49 : vector<4x256xf32> to vector<1x4x256xf32>
    tpu.vector_store %arg3[%c1_25, %c0_26, %c0_27], %52 {strides = array<i32>} : memref<2x4x256xf32, #tpu.memory_space<vmem>>, vector<1x4x256xf32>,
    %c0_28 = arith.constant 0 : index
    %c0_29 = arith.constant 0 : index
    %53 = vector.load %arg4[%c0_28, %c0_29] : memref<4x2xf32, #tpu.memory_space<vmem>>, vector<4x1xf32>
    tpu.vector_store %arg4[%c0_28, %c0_29], %8 {strides = array<i32>} : memref<4x2xf32, #tpu.memory_space<vmem>>, vector<4x1xf32>,
    %c0_30 = arith.constant 0 : index
    %c1_31 = arith.constant 1 : index
    %54 = vector.load %arg4[%c0_30, %c1_31] : memref<4x2xf32, #tpu.memory_space<vmem>>, vector<4x1xf32>
    tpu.vector_store %arg4[%c0_30, %c1_31], %23 {strides = array<i32>} : memref<4x2xf32, #tpu.memory_space<vmem>>, vector<4x1xf32>,
    return
  }
  func.func @transform_0(%arg0: i32) -> (i32, i32, i32) {
    %c0_i32 = arith.constant 0 : i32
    %c0_i32_0 = arith.constant 0 : i32
    %c0_i32_1 = arith.constant 0 : i32
    %c0_i32_2 = arith.constant 0 : i32
    return %c0_i32, %c0_i32_0, %c0_i32_1 : i32, i32, i32
  }
  func.func @transform_1(%arg0: i32) -> (i32, i32) {
    %c0_i32 = arith.constant 0 : i32
    %c0_i32_0 = arith.constant 0 : i32
    %c0_i32_1 = arith.constant 0 : i32
    return %c0_i32, %c0_i32_0 : i32, i32
  }
  func.func @transform_2(%arg0: i32) -> (i32, i32, i32) {
    %c0_i32 = arith.constant 0 : i32
    %c0_i32_0 = arith.constant 0 : i32
    %c0_i32_1 = arith.constant 0 : i32
    %c0_i32_2 = arith.constant 0 : i32
    return %c0_i32, %c0_i32_0, %c0_i32_1 : i32, i32, i32
  }
  func.func @transform_3(%arg0: i32) -> (i32, i32) {
    %c0_i32 = arith.constant 0 : i32
    %c0_i32_0 = arith.constant 0 : i32
    %c0_i32_1 = arith.constant 0 : i32
    return %c0_i32, %c0_i32_0 : i32, i32
  }
}

</mosaic_0001>

<bundles_post_ra>
// kernel: tpu_custom_call.1
= control target key start
LH: loop header
LB: loop body
LE: loop exit
PB: predicated region body
PF: predicated region fallthrough
CT: control target
= control target key end

     0   :  { %9 = vsyncpa [#allocation3], 0  ;;  %s257_s0 = inlined_call_operand.hbm [shape: f32[2,4,256], index: 0, kind: input, shape index: {}]   ;;  %s258_s1 = inlined_call_operand.vmem [shape: f32[4,2], index: 1, kind: input, shape index: {}]   ;;  %s259_s2 = inlined_call_operand.hbm [shape: f32[2,4,256], index: 2, kind: output, shape index: {0}]   ;;  %s260_s3 = inlined_call_operand.vmem [shape: f32[4,2], index: 3, kind: output, shape index: {1}]  }
   0x1   :  { %10 = vsyncpa [#allocation4], 0  ;;  %s187_s12 = smov [#allocation2]   ;;  %s139_s16 = scalar_lea.hbm %s257_s0, 256 }
   0x2   :  { %s16_s13 = sshll.u32 %s187_s12, 4  ;;  %p140_p0 = scmp.ne.s32.totalorder %s257_s0, %s139_s16  ;;  %s17_s13 = int_to_ptr.vmem [resolvable:$true] %s16_s13 }
   0x3   :  { %p143_p1 = scmp.lt.u32.totalorder %s139_s16, %s257_s0 }
   0x5   :  { %p145_p2 = pnand %p143_p1, %p140_p0 }
   0x7   :  { %148 = shalt.err (!%p145_p2)
}
   0x8   :  { %s149_s21 = scalar_lea.vmem %s17_s13, 256  ;;  %p154_p4 = scmp.lt.s32.totalorder %s17_s13, %s17_s13 }
   0x9   :  { %p150_p3 = scmp.ne.s32.totalorder %s17_s13, %s149_s21  ;;  %p155_p5 = scmp.lt.s32.totalorder %s149_s21, %s149_s21 }
   0xb   :  { %p156_p6 = por %p155_p5, %p154_p4 }
   0xd   :  { %p157_p7 = pnand %p156_p6, %p150_p3 }
   0xf   :  { %160 = shalt.err (!%p157_p7)
}
  0x10   :  { %s188_s22 = smov 128   ;;  %s189_s23 = smov 8  }
  0x11   :  { %22 = dma.hbm_to_vmem [thread:$0]  %s257_s0, 256, %s17_s13, [#allocation3], %s188_s22, %s188_s22, %s189_s23  }
  0x12   :  { %183 = dma.done.wait [#allocation3], 256  }
  0x13   :  { %184 = vsyncadd [#allocation3], 4294967040  ;;  %v28_v0 = vld [vmem:[#allocation2] sm:$0xff]  ;;  %v30_v1 = vld [vmem:[#allocation2 + $0x8] sm:$0xff]  ;;  %vm35_vm0 = vcmask 1043456   ;;  %v46_v9 = vlaneseq  ;;  %vm102_vm1 = vcmask 3072  }
  0x14   :  { %v31_v2 = vadd.f32 %v30_v1, %v28_v0  ;;  %v190_v7 = vmov 839922192   ;;  %v191_v25 = vmov 0   ;;  %v192_v26 = vmov 1   ;;  %v65_v30 = vld [vmem:[%s258_s1] sm:$0xf] }
  0x15   :  { %v44_v8 = vunpack.c.l.s4 %v190_v7  ;;  %v47_v11 = vshrl.u32 %v46_v9, 7  ;;  %134 = vset.pattern.permute.xlu1 %v191_v25  ;;  %136 = vset.pattern.permute.xlu0 %v192_v26  ;;  %vm104_vm2 = vcmask 11272   ;;  %s193_s4 = smov [#allocation5]  }
  0x16   :  { %v33_v3 = vcombine.high %v31_v2, %v31_v2  ;;  %v36_v4 = vsel %vm35_vm0, %v31_v2, 0.0  ;;  %s111_s5 = sshll.u32 %s193_s4, 4  ;;  %s112_s5 = int_to_ptr.vmem [resolvable:$true] %s111_s5 }
  0x17   :  { %v45_v10 = vunpack.c.0.s8 %v44_v8  ;;  %p166_p9 = scmp.lt.s32.totalorder %s112_s5, %s112_s5 }
  0x18   :  { %v37_v5 = vsel %vm35_vm0, %v33_v3, 0.0 }
  0x19   :  { %v38_v6 = vadd.f32 %v37_v5, %v36_v4  ;;  %v48_v12 = vsub.s32 %v45_v10, %v47_v11 }
  0x1b   :  { %39 = vadd.xlane.f32.xlu0 %v38_v6 }
  0xa8   :  { %v40_v13 = vpop.xlane.xlu0 %39 }
  0xa9   :  { %v41_v14 = vmul.f32 0.001953125, %v40_v13 }
  0xab   :  { %v49_v15 = vrot.slane %v41_v14, %v48_v12  ;;  %103 = vst.msk [vmem:[%s260_s3] sm:$0xf] %vm102_vm1, %v41_v14 }
  0xad   :  { %v51_v16 = vsub.f32 %v28_v0, %v49_v15  ;;  %v53_v17 = vsub.f32 %v30_v1, %v49_v15 }
  0xaf   :  { %v52_v18 = vmul.f32 %v51_v16, %v51_v16  ;;  %v54_v19 = vmul.f32 %v53_v17, %v53_v17 }
  0xb1   :  { %v55_v20 = vadd.f32 %v54_v19, %v52_v18 }
  0xb3   :  { %v57_v21 = vcombine.high %v55_v20, %v55_v20  ;;  %v59_v22 = vsel %vm35_vm0, %v55_v20, 0.0 }
  0xb5   :  { %v60_v23 = vsel %vm35_vm0, %v57_v21, 0.0 }
  0xb6   :  { %v61_v24 = vadd.f32 %v60_v23, %v59_v22 }
  0xb8   :  { %62 = vadd.xlane.f32.xlu0 %v61_v24 }
 0x145   :  { %v63_v27 = vpop.xlane.xlu0 %62 }
 0x146   :  { %v64_v28 = vmul.f32 0.001953125, %v63_v27 }
 0x148   :  { %v66_v29 = vadd.f32 1e-05, %v64_v28  ;;  %105 = vst.msk [vmem:[%s260_s3] sm:$0xf] %vm104_vm2, %v64_v28  ;;  %s161_s3 = scalar_lea.vmem %s112_s5, 256 }
 0x149   :  { %p162_p8 = scmp.ne.s32.totalorder %s112_s5, %s161_s3  ;;  %p167_p10 = scmp.lt.s32.totalorder %s161_s3, %s161_s3 }
 0x14a   :  { %137 = vrsqrt.f32 %v66_v29 }
 0x14b   :  { %p168_p11 = por %p167_p10, %p166_p9 }
 0x14d   :  { %p169_p12 = pnand %p168_p11, %p162_p8 }
 0x154   :  { %v138_v31 = vpop.eup %137 }
 0x155   :  { %v68_v32 = vmul.f32 %v138_v31, %v65_v30 }
 0x157   :  { %71 = vperm.xlu1 %134, %v68_v32  }
 0x15b   :  { %135 = vset.pattern.permute.xlu1 %v192_v26 }
 0x15c   :  { %84 = vperm.xlu1 %135, %v65_v30  }
 0x1d6   :  { %v72_v33 = vpop.permute.xlu1 %71 }
 0x1d7   :  { %v79_v34 = vrot.slane %v72_v33, %v48_v12 }
 0x1d9   :  { %v81_v36 = vmul.f32 %v79_v34, %v51_v16  ;;  %v98_v37 = vmul.f32 %v79_v34, %v53_v17 }
 0x1db   :  { %v85_v35 = vpop.permute.xlu1 %84 }
 0x1dc   :  { %v92_v38 = vrot.slane %v85_v35, %v48_v12 }
 0x1de   :  { %v94_v39 = vadd.f32 %v92_v38, %v81_v36  ;;  %v99_v40 = vadd.f32 %v98_v37, %v92_v38 }
 0x1e0   :  { %95 = vst [vmem:[#allocation5] sm:$0xff] %v94_v39  ;;  %101 = vst [vmem:[#allocation5 + $0x8] sm:$0xff] %v99_v40 }
 0x1e1   :  { %172 = shalt.err (!%p169_p12)
}
 0x1e2   :  { %s173_s7 = scalar_lea.hbm %s259_s2, 256 }
 0x1e3   :  { %p174_p13 = scmp.ne.s32.totalorder %s259_s2, %s173_s7  ;;  %p177_p0 = scmp.lt.u32.totalorder %s173_s7, %s259_s2 }
 0x1e5   :  { %p179_p1 = pnand %p177_p0, %p174_p13 }
 0x1e7   :  { %182 = shalt.err (!%p179_p1)
}
 0x1e8   :  { %117 = dma.vmem_to_hbm [thread:$0]  %s112_s5, 256, %s259_s2, [#allocation4], %s188_s22, %s188_s22, %s189_s23  }
 0x1e9   :  { %185 = dma.done.wait [#allocation4], 256  }
 0x1ea   :  { %186 = vsyncadd [#allocation4], 4294967040 }
 0x1eb   :  { %125 = vsyncpa [#allocation3], 1 }
 0x1ec   :  { %126 = vsyncpa [#allocation4], 1 }

</bundles_post_ra>
